<compile_context>
chip_gen: v7x
topology: tpu7x:2x2x1
jax: 0.10.0
libtpu: 0.0.40
codegen_flags: <defaults>
</compile_context>

<pallas_src>
import functools

import jax
import jax.numpy as jnp
from jax.experimental import pallas as pl
from jax.experimental.pallas import tpu as pltpu

_LANES = 512                     # lane-dense last dim (multiple of 128)
_MAX_BLOCK_ROWS = 1024           # 1024 * 512 * 4 B = 2 MiB / stream / buffer
_VMEM_LIMIT = 32 * 1024 * 1024   # explicit scoped-VMEM limit, safe on v5e/v6e/v7x


def _cdiv(a, b):
    return -(-a // b)


def _round_up(a, b):
    return _cdiv(a, b) * b


def _sublane(dtype):
    """Second-minor alignment for dtype tiling: f32 -> 8, bf16 -> 16, i8 -> 32."""
    return max(8, 32 // jnp.dtype(dtype).itemsize)


def _choose_tiling(n_elem, sub):
    """Return (rows, block_rows, num_blocks); block_rows divides rows exactly."""
    rows = _round_up(_cdiv(n_elem, _LANES), sub)
    if rows <= sub:
        return rows, rows, 1
    # >= 2 programs so the "parallel" grid axis feeds both v7x TensorCores;
    # blocks capped at _MAX_BLOCK_ROWS so the double-buffered footprint stays
    # well inside the scoped VMEM limit on every generation.
    num_blocks = max(2, _cdiv(rows, _MAX_BLOCK_ROWS))
    block_rows = min(_MAX_BLOCK_ROWS, _round_up(_cdiv(rows, num_blocks), sub))
    num_blocks = _cdiv(rows, block_rows)
    rows = num_blocks * block_rows           # < 1% padding in the worst case
    return rows, block_rows, num_blocks


def _make_kernel(inv_tau, threshold):
    """Kernel with tau / threshold baked in as immediates."""

    def kernel(x_ref, v_ref, spikes_ref, v_out_ref):
        x = x_ref[...].astype(jnp.float32)   # native-dtype input, cast in-register
        v = v_ref[...]
        v_new = v + (x - v) * inv_tau        # leaky integration
        spiked = v_new >= threshold          # single compare drives spike + reset
        spikes_ref[...] = spiked.astype(jnp.float32)
        v_out_ref[...] = jnp.where(spiked, jnp.float32(0.0), v_new)

    return kernel


@functools.partial(jax.jit, static_argnums=(2, 3), donate_argnums=(1,))
def lif_forward(input_current, v2d, inv_tau, threshold):
    """One LIF step.

    `v2d` is the persistent padded (rows, _LANES) f32 state (donated; its HBM
    buffer is reused for the new state via input_output_aliases).
    Returns (spikes shaped like input_current, new padded v2d).
    """
    orig_shape = input_current.shape
    n = input_current.size
    rows, lanes = v2d.shape
    total = rows * lanes
    _, block_rows, num_blocks = _choose_tiling(n, _sublane(input_current.dtype))

    flat = jnp.ravel(input_current)          # keep native dtype; cast in-kernel
    if flat.shape[0] != total:
        flat = jnp.pad(flat, (0, total - flat.shape[0]))
    x2d = flat.reshape(rows, lanes)

    spec = pl.BlockSpec((block_rows, lanes), lambda i: (i, 0))
    spikes2d, v_out2d = pl.pallas_call(
        _make_kernel(inv_tau, threshold),
        out_shape=(
            jax.ShapeDtypeStruct((rows, lanes), jnp.float32),
            jax.ShapeDtypeStruct((rows, lanes), jnp.float32),
        ),
        grid=(num_blocks,),
        in_specs=(spec, spec),
        out_specs=(spec, spec),
        input_output_aliases={1: 1},         # v_in buffer reused as v_out
        compiler_params=pltpu.CompilerParams(
            dimension_semantics=("parallel",),
            vmem_limit_bytes=_VMEM_LIMIT,
        ),
    )(x2d, v2d)

    spikes_flat = spikes2d.reshape(-1)
    if total != n:
        spikes_flat = spikes_flat[:n]
    return spikes_flat.reshape(orig_shape), v_out2d


class LIFNeuron:
    """Stateful wrapper mirroring the PyTorch module (tau/threshold honored)."""

    def __init__(self, tau=2.0, threshold=1.0):
        self.tau = float(tau)
        self.threshold = float(threshold)
        self._inv_tau = 1.0 / self.tau
        self.v = None        # membrane potential, kept in padded (rows, 512) f32
        self._key = None     # (shape, dtype) the state layout was built for

    def __call__(self, input_current):
        key = (tuple(input_current.shape), jnp.dtype(input_current.dtype).name)
        if self.v is None or self._key != key:
            rows, _, _ = _choose_tiling(input_current.size,
                                        _sublane(input_current.dtype))
            self.v = jnp.zeros((rows, _LANES), jnp.float32)
            self._key = key
        spikes, self.v = lif_forward(input_current, self.v,
                                     self._inv_tau, self.threshold)
        return spikes

    def membrane_potential(self, shape=None):
        """Membrane potential in user layout (for inspection / tests)."""
        shape = self._key[0] if shape is None else tuple(shape)
        n = 1
        for d in shape:
            n *= d
        return self.v.reshape(-1)[:n].reshape(shape)


def _reference(x, v, tau, threshold):
    # Same fp ordering as the kernel (multiply by 1/tau) for exact comparison.
    inv_tau = jnp.float32(1.0 / tau)
    v_new = v + (x - v) * inv_tau
    spikes = (v_new >= threshold).astype(jnp.float32)
    return spikes, v_new * (1.0 - spikes)


if __name__ == "__main__":
    key = jax.random.PRNGKey(0)
    # NCHW input, same convention the PyTorch module would receive.
    x = jax.random.normal(key, (2, 4, 16, 16), dtype=jnp.float32) * 3.0

    neuron = LIFNeuron()
    s1 = neuron(x)          # first call: v starts at zeros
    s2 = neuron(x)          # second call: exercises the stateful path
    jax.block_until_ready(s2)

    r_s1, r_v1 = _reference(x, jnp.zeros_like(x), 2.0, 1.0)
    r_s2, r_v2 = _reference(x, r_v1, 2.0, 1.0)
    assert jnp.array_equal(s1, r_s1), "first step spikes mismatch"
    assert jnp.array_equal(s2, r_s2), "second step spikes mismatch"
    assert jnp.allclose(neuron.membrane_potential(), r_v2, atol=1e-6), \
        "state mismatch"

    # Non-default tau/threshold + a shape whose element count is NOT a multiple
    # of 8*512 (exercises the padding path and the baked-in constants).
    y = jax.random.normal(jax.random.PRNGKey(1), (3, 5, 7), dtype=jnp.float32) * 2.0
    neuron2 = LIFNeuron(tau=1.5, threshold=0.5)
    t1 = neuron2(y)
    jax.block_until_ready(t1)
    q_s1, q_v1 = _reference(y, jnp.zeros_like(y), 1.5, 0.5)
    assert jnp.array_equal(t1, q_s1), "custom-params spikes mismatch"
    assert jnp.allclose(neuron2.membrane_potential(), q_v1, atol=1e-6), \
        "custom-params state mismatch"

    print("KERNEL_OK")
</pallas_src>

<mosaic_0001>
module attributes {stable_mosaic.version = 11 : i64} {
  func.func @kernel(%arg0: i32, %arg1: memref<8x512xf32, #tpu.memory_space<vmem>>, %arg2: memref<8x512xf32, #tpu.memory_space<vmem>>, %arg3: memref<8x512xf32, #tpu.memory_space<vmem>>, %arg4: memref<8x512xf32, #tpu.memory_space<vmem>>) attributes {dimension_semantics = [#tpu.dimension_semantics<parallel>], iteration_bounds = array<i64: 1>, scalar_prefetch = 0 : i64, scratch_operands = 0 : i64, tpu.core_type = #tpu.core_type<tc>, window_params = [{transform_indices = @transform_0, window_bounds = array<i64: 8, 512>}, {transform_indices = @transform_1, window_bounds = array<i64: 8, 512>}, {transform_indices = @transform_2, window_bounds = array<i64: 8, 512>}, {transform_indices = @transform_3, window_bounds = array<i64: 8, 512>}]} {
    %c0 = arith.constant 0 : index
    %c0_0 = arith.constant 0 : index
    %0 = vector.load %arg1[%c0, %c0_0] : memref<8x512xf32, #tpu.memory_space<vmem>>, vector<8x512xf32>
    %c0_1 = arith.constant 0 : index
    %c0_2 = arith.constant 0 : index
    %1 = vector.load %arg2[%c0_1, %c0_2] : memref<8x512xf32, #tpu.memory_space<vmem>>, vector<8x512xf32>
    %2 = arith.subf %0, %1 : vector<8x512xf32>
    %cst = arith.constant 5.000000e-01 : f32
    %3 = vector.broadcast %cst : f32 to vector<8x512xf32>
    %4 = arith.mulf %2, %3 : vector<8x512xf32>
    %5 = arith.addf %1, %4 : vector<8x512xf32>
    %cst_3 = arith.constant 1.000000e+00 : f32
    %6 = vector.broadcast %cst_3 : f32 to vector<8x512xf32>
    %7 = arith.cmpf oge, %5, %6 : vector<8x512xf32>
    %8 = arith.extui %7 : vector<8x512xi1> to vector<8x512xi32>
    %9 = arith.sitofp %8 : vector<8x512xi32> to vector<8x512xf32>
    %c0_4 = arith.constant 0 : index
    %c0_5 = arith.constant 0 : index
    %10 = vector.load %arg3[%c0_4, %c0_5] : memref<8x512xf32, #tpu.memory_space<vmem>>, vector<8x512xf32>
    tpu.vector_store %arg3[%c0_4, %c0_5], %9 {strides = array<i32>} : memref<8x512xf32, #tpu.memory_space<vmem>>, vector<8x512xf32>,
    %cst_6 = arith.constant 0.000000e+00 : f32
    %11 = vector.broadcast %cst_6 : f32 to vector<8x512xf32>
    %12 = arith.select %7, %11, %5 : vector<8x512xi1>, vector<8x512xf32>
    %c0_7 = arith.constant 0 : index
    %c0_8 = arith.constant 0 : index
    %13 = vector.load %arg4[%c0_7, %c0_8] : memref<8x512xf32, #tpu.memory_space<vmem>>, vector<8x512xf32>
    tpu.vector_store %arg4[%c0_7, %c0_8], %12 {strides = array<i32>} : memref<8x512xf32, #tpu.memory_space<vmem>>, vector<8x512xf32>,
    return
  }
  func.func @transform_0(%arg0: i32) -> (i32, i32) {
    %c0_i32 = arith.constant 0 : i32
    %c0_i32_0 = arith.constant 0 : i32
    return %arg0, %c0_i32 : i32, i32
  }
  func.func @transform_1(%arg0: i32) -> (i32, i32) {
    %c0_i32 = arith.constant 0 : i32
    %c0_i32_0 = arith.constant 0 : i32
    return %arg0, %c0_i32 : i32, i32
  }
  func.func @transform_2(%arg0: i32) -> (i32, i32) {
    %c0_i32 = arith.constant 0 : i32
    %c0_i32_0 = arith.constant 0 : i32
    return %arg0, %c0_i32 : i32, i32
  }
  func.func @transform_3(%arg0: i32) -> (i32, i32) {
    %c0_i32 = arith.constant 0 : i32
    %c0_i32_0 = arith.constant 0 : i32
    return %arg0, %c0_i32 : i32, i32
  }
}

</mosaic_0001>

<bundles_post_ra>
// kernel: lif_forward.1
= control target key start
LH: loop header
LB: loop body
LE: loop exit
PB: predicated region body
PF: predicated region fallthrough
CT: control target
= control target key end

     0   :  { %v70_v20 = vmov 0.0   ;;  %s139_s0 = inlined_call_operand.vmem [shape: f32[8,512], index: 0, kind: input, shape index: {}]   ;;  %s140_s1 = inlined_call_operand.vmem [shape: f32[8,512], index: 1, kind: input, shape index: {}, may-alias: {1,3}]   ;;  %s141_s2 = inlined_call_operand.vmem [shape: f32[8,512], index: 2, kind: output, shape index: {0}]   ;;  %s142_s3 = inlined_call_operand.vmem [shape: f32[8,512], index: 3, kind: output, shape index: {1}, may-alias: {1,3}]  }
   0x1   :  { %v13_v0 = vld [vmem:[%s139_s0] sm:$0xff]  ;;  %v14_v2 = vld [vmem:[%s139_s0 + $0x8] sm:$0xff]  ;;  %v15_v5 = vld [vmem:[%s139_s0 + $0x10] sm:$0xff] }
   0x2   :  { %v17_v1 = vld [vmem:[%s140_s1] sm:$0xff]  ;;  %v18_v4 = vld [vmem:[%s140_s1 + $0x8] sm:$0xff]  ;;  %v19_v6 = vld [vmem:[%s140_s1 + $0x10] sm:$0xff] }
   0x3   :  { %v21_v3 = vsub.f32 %v13_v0, %v17_v1  ;;  %v22_v7 = vsub.f32 %v14_v2, %v18_v4  ;;  %v23_v8 = vsub.f32 %v15_v5, %v19_v6  ;;  %v16_v9 = vld [vmem:[%s139_s0 + $0x18] sm:$0xff] }
   0x4   :  { %v20_v10 = vld [vmem:[%s140_s1 + $0x18] sm:$0xff] }
   0x5   :  { %v25_v11 = vmul.f32 0.5, %v21_v3  ;;  %v24_v12 = vsub.f32 %v16_v9, %v20_v10  ;;  %v26_v13 = vmul.f32 0.5, %v22_v7  ;;  %v27_v14 = vmul.f32 0.5, %v23_v8 }
   0x7   :  { %v29_v15 = vadd.f32 %v25_v11, %v17_v1  ;;  %v28_v16 = vmul.f32 0.5, %v24_v12  ;;  %v30_v17 = vadd.f32 %v26_v13, %v18_v4  ;;  %v31_v18 = vadd.f32 %v27_v14, %v19_v6 }
   0x9   :  { %vm33_vm0 = vcmp.ge.f32.partialorder %v29_v15, 1.0  ;;  %v32_v19 = vadd.f32 %v28_v16, %v20_v10  ;;  %vm34_vm1 = vcmp.ge.f32.partialorder %v30_v17, 1.0  ;;  %vm35_vm2 = vcmp.ge.f32.partialorder %v31_v18, 1.0 }
   0xa   :  { %v65_v21 = vsel %vm33_vm0, 1.0, %v70_v20  ;;  %v49_v22 = vsel %vm33_vm0, 0.0, %v29_v15  ;;  %v66_v23 = vsel %vm34_vm1, 1.0, %v70_v20  ;;  %v67_v24 = vsel %vm35_vm2, 1.0, %v70_v20 }
   0xb   :  { %45 = vst [vmem:[%s141_s2] sm:$0xff] %v65_v21  ;;  %vm36_vm3 = vcmp.ge.f32.partialorder %v32_v19, 1.0  ;;  %53 = vst [vmem:[%s142_s3] sm:$0xff] %v49_v22  ;;  %v50_v25 = vsel %vm34_vm1, 0.0, %v30_v17  ;;  %v51_v27 = vsel %vm35_vm2, 0.0, %v31_v18 }
   0xc   :  { %46 = vst [vmem:[%s141_s2 + $0x8] sm:$0xff] %v66_v23  ;;  %47 = vst [vmem:[%s141_s2 + $0x10] sm:$0xff] %v67_v24  ;;  %v68_v26 = vsel %vm36_vm3, 1.0, %v70_v20  ;;  %v52_v28 = vsel %vm36_vm3, 0.0, %v32_v19 }
   0xd   :  { %54 = vst [vmem:[%s142_s3 + $0x8] sm:$0xff] %v50_v25  ;;  %48 = vst [vmem:[%s141_s2 + $0x18] sm:$0xff] %v68_v26 }
   0xe   :  { %55 = vst [vmem:[%s142_s3 + $0x10] sm:$0xff] %v51_v27  ;;  %56 = vst [vmem:[%s142_s3 + $0x18] sm:$0xff] %v52_v28 }

</bundles_post_ra>
